<compile_context>
chip_gen: v7x
topology: tpu7x:2x2x1
jax: 0.10.0
libtpu: 0.0.40
codegen_flags: <defaults>
</compile_context>

<pallas_src>
import functools

import jax
import jax.numpy as jnp
from jax.experimental import pallas as pl
from jax.experimental.pallas import tpu as pltpu


def _cdiv(a, b):
    return -(-a // b)


def _round_up(v, m):
    return (v + m - 1) // m * m


def _fourier_loss_kernel(x_ref, y_ref, rhs_ref, out_ref):
    j = pl.program_id(1)

    # Output block is resident across the frequency ("arbitrary") axis.
    @pl.when(j == 0)
    def _():
        out_ref[...] = jnp.zeros_like(out_ref)

    tn = rhs_ref.shape[1] // 2                # kept frequency columns per block
    rhs = rhs_ref[...]                        # (L, 2*TN) bf16, window + 1/sqrt(L) folded

    # Two MXU calls against the same resident RHS block (no in-kernel concat),
    # bf16 inputs, f32 accumulation.
    fx = jnp.dot(x_ref[...], rhs, preferred_element_type=jnp.float32)   # (TM, 2*TN)
    fy = jnp.dot(y_ref[...], rhs, preferred_element_type=jnp.float32)

    x_re, x_im = fx[:, :tn], fx[:, tn:]
    y_re, y_im = fy[:, :tn], fy[:, tn:]

    x_amp = jnp.sqrt(x_re * x_re + x_im * x_im)
    y_amp = jnp.sqrt(y_re * y_re + y_im * y_im)
    x_ph = jnp.arctan2(x_im, x_re)
    y_ph = jnp.arctan2(y_im, y_re)

    # Columns >= half_u and padded rows/columns have rhs == 0, so re = im = 0,
    # amp = 0 and atan2(0, 0) = 0 for both x and y -> zero contribution.
    # Single fused reduce for both terms.
    partial = jnp.sum(jnp.abs(x_amp - y_amp) + 0.5 * jnp.abs(x_ph - y_ph))

    # Lane-dense (8, 128) accumulator; wrapper reads element [0, 0] per block.
    out_ref[...] += partial


@functools.lru_cache(maxsize=8)
def _build_dft_rhs(L, half_u, tn, gj):
    """Window-folded, ortho-normalized, Hermitian-truncated DFT matrix.

    Layout: per frequency block j, the tn cos columns are immediately followed
    by the tn (-sin) columns, so one (L, 2*tn) BlockSpec slab holds both.
    Shape: (L, gj * 2 * tn), bf16.  Cached per static shape.
    """
    n_pad = gj * tn
    t = jnp.arange(L, dtype=jnp.float32)
    # torch.hann_window(L, periodic=True): w[n] = 0.5 - 0.5*cos(2*pi*n/L)
    window = 0.5 - 0.5 * jnp.cos(2.0 * jnp.pi * t / jnp.float32(L))

    # (n*k) mod L via hi/lo split so int32 never overflows (works up to
    # L = 65536 and beyond).
    nn = jnp.arange(L, dtype=jnp.int32)[:, None]
    kk = jnp.arange(n_pad, dtype=jnp.int32)[None, :]
    k_hi, k_lo = kk // 256, kk % 256
    nk = ((nn * k_lo) % L + (((nn * k_hi) % L) * 256) % L) % L
    ang = 2.0 * jnp.pi * nk.astype(jnp.float32) / jnp.float32(L)

    scale = 1.0 / jnp.sqrt(jnp.float32(L))
    keep = (jnp.arange(n_pad) < half_u).astype(jnp.float32)[None, :]
    wcol = (window * scale)[:, None]
    cos_m = jnp.cos(ang) * wcol * keep
    msin_m = -jnp.sin(ang) * wcol * keep

    rhs = jnp.stack(
        [cos_m.reshape(L, gj, tn), msin_m.reshape(L, gj, tn)], axis=2
    ).reshape(L, gj * 2 * tn)
    return rhs.astype(jnp.bfloat16)


def fourier_space_loss(x, y):
    """x, y: (B, C, H, W) float arrays. Returns scalar loss (matches PyTorch module)."""
    B, C, H, W = x.shape
    L = H * W
    M = B * C
    half_u = L // 2 - 1

    # ---- per-generation VMEM budget (v7x: 64 MiB physical, v5e/v6e: 128 MiB) ----
    try:
        vmem_phys = int(pltpu.get_tpu_info().vmem_capacity_bytes)
    except Exception:
        vmem_phys = 64 * 1024 * 1024
    vmem_budget = min((vmem_phys * 3) // 4, 96 * 1024 * 1024)

    # ---- frequency tile: lane-aligned, RHS double-buffer (2*L*2*TN*2 bytes)
    #      gets ~half the budget ----
    n_min = _round_up(max(half_u, 1), 128)
    tn_cap = max(128, (vmem_budget // 2) // (16 * L) // 128 * 128)
    TN = max(128, min(tn_cap, 1024, n_min))
    Gj = _cdiv(n_min, TN)
    N_pad = Gj * TN

    # ---- row tile over fused B*C: bf16 double-buffered x/y (8*TM*L bytes)
    #      plus f32 matmul outputs / elementwise temps (~40*TM*TN bytes) ----
    tm_cap = max(8, (vmem_budget // 2) // (8 * L + 40 * TN) // 8 * 8)
    TM = min(tm_cap, 256)
    # >= 2 parallel row blocks when M >= 16 so v7x's 2nd TensorCore gets work.
    TM = min(TM, max(8, _round_up(_cdiv(M, 2), 8)))
    Gi = _cdiv(M, TM)
    M_pad = Gi * TM

    # bf16 inputs (window is folded into the DFT matrix).  Zero-padded rows
    # contribute nothing (re = im = 0 for both operands).
    x2 = x.reshape(M, L).astype(jnp.bfloat16)
    y2 = y.reshape(M, L).astype(jnp.bfloat16)
    if M_pad != M:
        x2 = jnp.pad(x2, ((0, M_pad - M), (0, 0)))
        y2 = jnp.pad(y2, ((0, M_pad - M), (0, 0)))

    rhs = _build_dft_rhs(L, half_u, TN, Gj)

    cost = pl.CostEstimate(
        flops=int(8 * M_pad * L * N_pad),                    # 2 dots per step
        transcendentals=int(10 * M_pad * N_pad),             # sqrt + atan2 (approx)
        bytes_accessed=int(2 * M_pad * L * 2                 # x, y (bf16, once)
                           + Gi * L * 2 * N_pad * 2          # rhs (once per row block)
                           + Gi * 8 * 128 * 4),              # partial-sum slab
    )

    out = pl.pallas_call(
        _fourier_loss_kernel,
        out_shape=jax.ShapeDtypeStruct((Gi * 8, 128), jnp.float32),
        grid=(Gi, Gj),
        in_specs=[
            pl.BlockSpec((TM, L), lambda i, j: (i, 0)),        # x rows (resident across j)
            pl.BlockSpec((TM, L), lambda i, j: (i, 0)),        # y rows (resident across j)
            pl.BlockSpec((L, 2 * TN), lambda i, j: (0, j)),    # [cos | -sin] DFT slab
        ],
        out_specs=pl.BlockSpec((8, 128), lambda i, j: (i, 0)),  # lane-dense partials
        compiler_params=pltpu.CompilerParams(
            dimension_semantics=("parallel", "arbitrary"),
            vmem_limit_bytes=int(vmem_budget),
        ),
        cost_estimate=cost,
    )(x2, y2, rhs)

    total = out.reshape(Gi, 8, 128)[:, 0, 0].sum()
    # nn.L1Loss means over B*half_u elements per channel; final /3 as in module.
    return total / jnp.float32(B * half_u) / 3.0


def _reference_loss(x, y):
    """Pure-JAX mirror of the PyTorch forward (uses jnp.fft) for validation."""
    B, C, H, W = x.shape
    L = H * W
    n = jnp.arange(L, dtype=jnp.float32)
    window = 0.5 - 0.5 * jnp.cos(2.0 * jnp.pi * n / jnp.float32(L))
    xr = x.reshape(B, C, L) * window
    yr = y.reshape(B, C, L) * window
    loss = 0.0
    half_u = L // 2 - 1
    for i in range(C):
        xf = jnp.fft.fft(xr[:, i, :], norm="ortho")
        yf = jnp.fft.fft(yr[:, i, :], norm="ortho")
        x_amp = jnp.abs(xf)
        y_amp = jnp.abs(yf)
        x_ph = jnp.arctan2(jnp.imag(xf), jnp.real(xf))
        y_ph = jnp.arctan2(jnp.imag(yf), jnp.real(yf))
        loss_amp = jnp.mean(jnp.abs(x_amp[:, :half_u] - y_amp[:, :half_u]))
        loss_ph = jnp.mean(jnp.abs(x_ph[:, :half_u] - y_ph[:, :half_u]))
        loss = loss + loss_amp + loss_ph / 2.0
    return loss / 3.0


if __name__ == "__main__":
    key = jax.random.PRNGKey(0)
    kx, ky = jax.random.split(key)
    B, C, H, W = 2, 4, 16, 16
    x = jax.random.normal(kx, (B, C, H, W), dtype=jnp.float32)
    y = jax.random.normal(ky, (B, C, H, W), dtype=jnp.float32)

    loss = jax.block_until_ready(fourier_space_loss(x, y))
    ref = jax.block_until_ready(_reference_loss(x, y))

    # Loose tolerance: bf16 MXU inputs/constants + unwrapped-phase terms near
    # tiny amplitudes are intrinsically noisy (matches the module's behavior).
    assert jnp.allclose(loss, ref, rtol=5e-2, atol=2e-2), (loss, ref)

    print("KERNEL_OK")
</pallas_src>

<mosaic_0001>
module attributes {stable_mosaic.version = 11 : i64} {
  func.func @_fourier_loss_kernel(%arg0: i32, %arg1: i32, %arg2: memref<8x256xbf16, #tpu.memory_space<vmem>>, %arg3: memref<8x256xbf16, #tpu.memory_space<vmem>>, %arg4: memref<256x256xbf16, #tpu.memory_space<vmem>>, %arg5: memref<8x128xf32, #tpu.memory_space<vmem>>) attributes {dimension_semantics = [#tpu.dimension_semantics<parallel>, #tpu.dimension_semantics<arbitrary>], iteration_bounds = array<i64: 1, 1>, scalar_prefetch = 0 : i64, scratch_operands = 0 : i64, tpu.core_type = #tpu.core_type<tc>, window_params = [{transform_indices = @transform_0, window_bounds = array<i64: 8, 256>}, {transform_indices = @transform_1, window_bounds = array<i64: 8, 256>}, {transform_indices = @transform_2, window_bounds = array<i64: 256, 256>}, {transform_indices = @transform_3, window_bounds = array<i64: 8, 128>}]} {
    %c0_i32 = arith.constant 0 : i32
    %0 = arith.cmpi eq, %arg1, %c0_i32 : i32
    %1 = arith.extui %0 : i1 to i32
    %c0_i32_0 = arith.constant 0 : i32
    %2 = arith.cmpi ne, %1, %c0_i32_0 : i32
    scf.if %2 {
      %cst_13 = arith.constant 0.000000e+00 : f32
      %37 = vector.broadcast %cst_13 : f32 to vector<8x128xf32>
      %c0_14 = arith.constant 0 : index
      %c0_15 = arith.constant 0 : index
      %38 = vector.load %arg5[%c0_14, %c0_15] : memref<8x128xf32, #tpu.memory_space<vmem>>, vector<8x128xf32>
      tpu.vector_store %arg5[%c0_14, %c0_15], %37 {strides = array<i32>} : memref<8x128xf32, #tpu.memory_space<vmem>>, vector<8x128xf32>,
    } else {
    }
    %c0 = arith.constant 0 : index
    %c0_1 = arith.constant 0 : index
    %3 = vector.load %arg4[%c0, %c0_1] : memref<256x256xbf16, #tpu.memory_space<vmem>>, vector<256x256xbf16>
    %c0_2 = arith.constant 0 : index
    %c0_3 = arith.constant 0 : index
    %4 = vector.load %arg2[%c0_2, %c0_3] : memref<8x256xbf16, #tpu.memory_space<vmem>>, vector<8x256xbf16>
    %cst = arith.constant dense<0.000000e+00> : vector<8x256xf32>
    %5 = tpu.matmul %4, %3, %cst {dimension_numbers = #tpu.dot_dimension_numbers<[1], [0], [0], [1], [0, 0, 1, 1], [], []>} : vector<8x256xbf16>, vector<256x256xbf16>, vector<8x256xf32> -> vector<8x256xf32>
    %c0_4 = arith.constant 0 : index
    %c0_5 = arith.constant 0 : index
    %6 = vector.load %arg3[%c0_4, %c0_5] : memref<8x256xbf16, #tpu.memory_space<vmem>>, vector<8x256xbf16>
    %cst_6 = arith.constant dense<0.000000e+00> : vector<8x256xf32>
    %7 = tpu.matmul %6, %3, %cst_6 {dimension_numbers = #tpu.dot_dimension_numbers<[1], [0], [0], [1], [0, 0, 1, 1], [], []>} : vector<8x256xbf16>, vector<256x256xbf16>, vector<8x256xf32> -> vector<8x256xf32>
    %8 = vector.extract_strided_slice %5 {offsets = [0, 0], sizes = [8, 128], strides = [1, 1]} : vector<8x256xf32> to vector<8x128xf32>
    %9 = vector.extract_strided_slice %5 {offsets = [0, 128], sizes = [8, 128], strides = [1, 1]} : vector<8x256xf32> to vector<8x128xf32>
    %10 = vector.extract_strided_slice %7 {offsets = [0, 0], sizes = [8, 128], strides = [1, 1]} : vector<8x256xf32> to vector<8x128xf32>
    %11 = vector.extract_strided_slice %7 {offsets = [0, 128], sizes = [8, 128], strides = [1, 1]} : vector<8x256xf32> to vector<8x128xf32>
    %12 = arith.mulf %8, %8 : vector<8x128xf32>
    %13 = arith.mulf %9, %9 : vector<8x128xf32>
    %14 = arith.addf %12, %13 : vector<8x128xf32>
    %15 = math.sqrt %14 : vector<8x128xf32>
    %16 = arith.mulf %10, %10 : vector<8x128xf32>
    %17 = arith.mulf %11, %11 : vector<8x128xf32>
    %18 = arith.addf %16, %17 : vector<8x128xf32>
    %19 = math.sqrt %18 : vector<8x128xf32>
    %20 = math.atan2 %9, %8 : vector<8x128xf32>
    %21 = math.atan2 %11, %10 : vector<8x128xf32>
    %22 = arith.subf %15, %19 : vector<8x128xf32>
    %23 = math.absf %22 : vector<8x128xf32>
    %24 = arith.subf %20, %21 : vector<8x128xf32>
    %25 = math.absf %24 : vector<8x128xf32>
    %cst_7 = arith.constant 5.000000e-01 : f32
    %26 = vector.broadcast %cst_7 : f32 to vector<8x128xf32>
    %27 = arith.mulf %26, %25 : vector<8x128xf32>
    %28 = arith.addf %23, %27 : vector<8x128xf32>
    %29 = vector.shape_cast %28 : vector<8x128xf32> to vector<1x8x128xf32>
    %cst_8 = arith.constant dense<0.000000e+00> : vector<1xf32>
    %30 = vector.multi_reduction <add>, %29, %cst_8 [1, 2] : vector<1x8x128xf32> to vector<1xf32>
    %31 = vector.shape_cast %30 : vector<1xf32> to vector<1x1x1xf32>
    %32 = vector.extract %31[0, 0, 0] : f32 from vector<1x1x1xf32>
    %c0_9 = arith.constant 0 : index
    %c0_10 = arith.constant 0 : index
    %33 = vector.load %arg5[%c0_9, %c0_10] : memref<8x128xf32, #tpu.memory_space<vmem>>, vector<8x128xf32>
    %34 = vector.broadcast %32 : f32 to vector<8x128xf32>
    %35 = arith.addf %33, %34 : vector<8x128xf32>
    %c0_11 = arith.constant 0 : index
    %c0_12 = arith.constant 0 : index
    %36 = vector.load %arg5[%c0_11, %c0_12] : memref<8x128xf32, #tpu.memory_space<vmem>>, vector<8x128xf32>
    tpu.vector_store %arg5[%c0_11, %c0_12], %35 {strides = array<i32>} : memref<8x128xf32, #tpu.memory_space<vmem>>, vector<8x128xf32>,
    return
  }
  func.func @transform_0(%arg0: i32, %arg1: i32) -> (i32, i32) {
    %c0_i32 = arith.constant 0 : i32
    %c0_i32_0 = arith.constant 0 : i32
    return %arg0, %c0_i32 : i32, i32
  }
  func.func @transform_1(%arg0: i32, %arg1: i32) -> (i32, i32) {
    %c0_i32 = arith.constant 0 : i32
    %c0_i32_0 = arith.constant 0 : i32
    return %arg0, %c0_i32 : i32, i32
  }
  func.func @transform_2(%arg0: i32, %arg1: i32) -> (i32, i32) {
    %c0_i32 = arith.constant 0 : i32
    %c0_i32_0 = arith.constant 0 : i32
    return %c0_i32, %arg1 : i32, i32
  }
  func.func @transform_3(%arg0: i32, %arg1: i32) -> (i32, i32) {
    %c0_i32 = arith.constant 0 : i32
    %c0_i32_0 = arith.constant 0 : i32
    return %arg0, %c0_i32 : i32, i32
  }
}

</mosaic_0001>

<bundles_post_ra>
// kernel: tpu_custom_call.1
= control target key start
LH: loop header
LB: loop body
LE: loop exit
PB: predicated region body
PF: predicated region fallthrough
CT: control target
= control target key end

     0   :  { %8 = vsyncpa [#allocation3], 0  ;;  %s886_s0 = inlined_call_operand.hbm [shape: bf16[8,256], index: 0, kind: input, shape index: {}]   ;;  %s887_s1 = inlined_call_operand.hbm [shape: bf16[8,256], index: 1, kind: input, shape index: {}]   ;;  %s888_s2 = inlined_call_operand.hbm [shape: bf16[256,256], index: 2, kind: input, shape index: {}]   ;;  %s889_s3 = inlined_call_operand.hbm [shape: f32[8,128], index: 3, kind: output, shape index: {}]  }
   0x1   :  { %9 = vsyncpa [#allocation6], 0 }
   0x2   :  { %10 = vsyncpa [#allocation4], 0  ;;  %s696_s12 = smov [#allocation5]   ;;  %s697_s14 = smov [#allocation2]  }
   0x3   :  { %s27_s13 = sshll.u32 %s696_s12, 4  ;;  %s17_s15 = sshll.u32 %s697_s14, 4  ;;  %s28_s13 = int_to_ptr.vmem [resolvable:$true] %s27_s13  ;;  %s18_s15 = int_to_ptr.vmem [resolvable:$true] %s17_s15 }
   0x4   :  { %s602_s18 = scalar_lea.hbm %s887_s1, 128 }
   0x5   :  { %p603_p0 = scmp.ne.s32.totalorder %s887_s1, %s602_s18  ;;  %p606_p1 = scmp.lt.u32.totalorder %s602_s18, %s887_s1 }
   0x7   :  { %p608_p2 = pnand %p606_p1, %p603_p0 }
   0x9   :  { %611 = shalt.err (!%p608_p2)
}
   0xa   :  { %s612_s23 = scalar_lea.vmem %s28_s13, 128  ;;  %p617_p4 = scmp.lt.s32.totalorder %s28_s13, %s28_s13 }
   0xb   :  { %p613_p3 = scmp.ne.s32.totalorder %s28_s13, %s612_s23  ;;  %p618_p5 = scmp.lt.s32.totalorder %s612_s23, %s612_s23 }
   0xd   :  { %p619_p6 = por %p618_p5, %p617_p4 }
   0xf   :  { %p620_p7 = pnand %p619_p6, %p613_p3 }
  0x11   :  { %623 = shalt.err (!%p620_p7)
}
  0x12   :  { %30 = dma.hbm_to_vmem [thread:$0]  %s887_s1, 128, %s28_s13, [#allocation6]  }
  0x13   :  { %s624_s28 = scalar_lea.hbm %s886_s0, 128 }
  0x14   :  { %p625_p8 = scmp.ne.s32.totalorder %s886_s0, %s624_s28  ;;  %p628_p9 = scmp.lt.u32.totalorder %s624_s28, %s886_s0 }
  0x16   :  { %p630_p10 = pnand %p628_p9, %p625_p8 }
  0x18   :  { %633 = shalt.err (!%p630_p10)
}
  0x19   :  { %s634_s6 = scalar_lea.vmem %s18_s15, 128  ;;  %p639_p12 = scmp.lt.s32.totalorder %s18_s15, %s18_s15 }
  0x1a   :  { %p635_p11 = scmp.ne.s32.totalorder %s18_s15, %s634_s6  ;;  %p640_p13 = scmp.lt.s32.totalorder %s634_s6, %s634_s6 }
  0x1c   :  { %p641_p0 = por %p640_p13, %p639_p12 }
  0x1e   :  { %p642_p1 = pnand %p641_p0, %p635_p11 }
  0x20   :  { %645 = shalt.err (!%p642_p1)
}
  0x21   :  { %20 = dma.hbm_to_vmem [thread:$0]  %s886_s0, 128, %s18_s15, [#allocation3]  }
  0x22   :  { %s698_s8 = smov [#allocation7]   ;;  %s646_s12 = scalar_lea.hbm %s888_s2, 4096 }
  0x23   :  { %s36_s9 = sshll.u32 %s698_s8, 4  ;;  %p647_p2 = scmp.ne.s32.totalorder %s888_s2, %s646_s12  ;;  %s37_s9 = int_to_ptr.vmem [resolvable:$true] %s36_s9 }
  0x24   :  { %p650_p3 = scmp.lt.u32.totalorder %s646_s12, %s888_s2 }
  0x26   :  { %p652_p4 = pnand %p650_p3, %p647_p2 }
  0x28   :  { %655 = shalt.err (!%p652_p4)
}
  0x29   :  { %s656_s18 = scalar_lea.vmem %s37_s9, 4096  ;;  %p661_p6 = scmp.lt.s32.totalorder %s37_s9, %s37_s9 }
  0x2a   :  { %p657_p5 = scmp.ne.s32.totalorder %s37_s9, %s656_s18  ;;  %p662_p7 = scmp.lt.s32.totalorder %s656_s18, %s656_s18 }
  0x2c   :  { %p663_p8 = por %p662_p7, %p661_p6 }
  0x2e   :  { %p664_p9 = pnand %p663_p8, %p657_p5 }
  0x30   :  { %667 = shalt.err (!%p664_p9)
}
  0x31   :  { %s699_s0 = smov 128   ;;  %s700_s15 = smov 8  }
  0x32   :  { %42 = dma.hbm_to_vmem [thread:$0]  %s888_s2, 4096, %s37_s9, [#allocation6], %s699_s0, %s699_s0, %s700_s15  }
  0x33   :  { %690 = dma.done.wait [#allocation3], 128  }
  0x34   :  { %691 = vsyncadd [#allocation3], 4294967168 }
  0x35   :  { %692 = dma.done.wait [#allocation6], 4224  }
  0x36   :  { %693 = vsyncadd [#allocation6], 4294963072  ;;  %v542_v0 = vld [vmem:[#allocation7 + $0x4] ss:$8 sps:$4 sm:$0xff]   ;;  %v544_v1 = vld [vmem:[#allocation7] ss:$8 sps:$4 sm:$0xff]  }
  0x37   :  { %257 = vmatprep.subr.bf16.mxu0 %v542_v0  ;;  %306 = vmatprep.subr.bf16.mxu1 %v542_v0  ;;  %v545_v2 = vld [vmem:[#allocation7 + $0x14] ss:$8 sps:$4 sm:$0xff]   ;;  %v547_v3 = vld [vmem:[#allocation7 + $0x10] ss:$8 sps:$4 sm:$0xff]   ;;  %v548_v4 = vld [vmem:[#allocation7 + $0x24] ss:$8 sps:$4 sm:$0xff]  }
  0x38   :  { %258 = vmatpush1.bf16.msra.mxu0 %v544_v1  ;;  %307 = vmatpush1.bf16.msra.mxu1 %v544_v1  ;;  %v550_v5 = vld [vmem:[#allocation7 + $0x20] ss:$8 sps:$4 sm:$0xff]   ;;  %v551_v6 = vld [vmem:[#allocation7 + $0x34] ss:$8 sps:$4 sm:$0xff]   ;;  %v553_v7 = vld [vmem:[#allocation7 + $0x30] ss:$8 sps:$4 sm:$0xff]  }
  0x39   :  { %259 = vmatprep.subr.bf16.mxu0 %v545_v2  ;;  %308 = vmatprep.subr.bf16.mxu1 %v545_v2  ;;  %v554_v8 = vld [vmem:[#allocation7 + $0x44] ss:$8 sps:$4 sm:$0xff]   ;;  %v556_v9 = vld [vmem:[#allocation7 + $0x40] ss:$8 sps:$4 sm:$0xff]   ;;  %v557_v10 = vld [vmem:[#allocation7 + $0x54] ss:$8 sps:$4 sm:$0xff]  }
  0x3a   :  { %v559_v11 = vld [vmem:[#allocation7 + $0x50] ss:$8 sps:$4 sm:$0xff]   ;;  %v560_v12 = vld [vmem:[#allocation7 + $0x64] ss:$8 sps:$4 sm:$0xff]   ;;  %v562_v17 = vld [vmem:[#allocation7 + $0x60] ss:$8 sps:$4 sm:$0xff]  }
  0x3b   :  { %v760_v13 = vld [vmem:[#allocation2] sm:$0xff]  ;;  %v762_v14 = vld [vmem:[#allocation5] sm:$0xff]  ;;  %v566_v20 = vld [vmem:[#allocation7 + $0x84] ss:$8 sps:$4 sm:$0xff]   ;;  %s703_s2 = smov [#allocation8]  }
  0x3c   :  { %260 = vmatpush1.bf16.msra.mxu0 %v547_v3  ;;  %309 = vmatpush1.bf16.msra.mxu1 %v547_v3  ;;  %v497_v15 = vcombine.high %v760_v13, %v760_v13  ;;  %v531_v16 = vcombine.high %v762_v14, %v762_v14  ;;  %v563_v18 = vld [vmem:[#allocation7 + $0x74] ss:$8 sps:$4 sm:$0xff]   ;;  %v565_v19 = vld [vmem:[#allocation7 + $0x70] ss:$8 sps:$4 sm:$0xff]   ;;  %v568_v21 = vld [vmem:[#allocation7 + $0x80] ss:$8 sps:$4 sm:$0xff]   ;;  %v496_v36 = vcombine.low %v760_v13, %v760_v13 }
  0x3d   :  { %261 = vmatprep.subr.bf16.mxu0 %v548_v4  ;;  %310 = vmatprep.subr.bf16.mxu1 %v548_v4  ;;  %v569_v22 = vld [vmem:[#allocation7 + $0x94] ss:$8 sps:$4 sm:$0xff]   ;;  %v571_v23 = vld [vmem:[#allocation7 + $0x90] ss:$8 sps:$4 sm:$0xff]   ;;  %v572_v24 = vld [vmem:[#allocation7 + $0xa4] ss:$8 sps:$4 sm:$0xff]   ;;  %v530_v37 = vcombine.low %v762_v14, %v762_v14 }
  0x3e   :  { %289 = vmatprep.mubr.bf16.mxu0 %v497_v15  ;;  %338 = vmatprep.mubr.bf16.mxu1 %v531_v16  ;;  %v574_v25 = vld [vmem:[#allocation7 + $0xa0] ss:$8 sps:$4 sm:$0xff]   ;;  %v575_v26 = vld [vmem:[#allocation7 + $0xb4] ss:$8 sps:$4 sm:$0xff]   ;;  %v577_v27 = vld [vmem:[#allocation7 + $0xb0] ss:$8 sps:$4 sm:$0xff]  }
  0x3f   :  { %v578_v28 = vld [vmem:[#allocation7 + $0xc4] ss:$8 sps:$4 sm:$0xff]   ;;  %v580_v29 = vld [vmem:[#allocation7 + $0xc0] ss:$8 sps:$4 sm:$0xff]   ;;  %v581_v30 = vld [vmem:[#allocation7 + $0xd4] ss:$8 sps:$4 sm:$0xff]  }
  0x40   :  { %262 = vmatpush1.bf16.msra.mxu0 %v550_v5  ;;  %311 = vmatpush1.bf16.msra.mxu1 %v550_v5  ;;  %v583_v31 = vld [vmem:[#allocation7 + $0xd0] ss:$8 sps:$4 sm:$0xff]   ;;  %v584_v32 = vld [vmem:[#allocation7 + $0xe4] ss:$8 sps:$4 sm:$0xff]   ;;  %v586_v33 = vld [vmem:[#allocation7 + $0xe0] ss:$8 sps:$4 sm:$0xff]  }
  0x41   :  { %263 = vmatprep.subr.bf16.mxu0 %v551_v6  ;;  %312 = vmatprep.subr.bf16.mxu1 %v551_v6  ;;  %v587_v34 = vld [vmem:[#allocation7 + $0xf4] ss:$8 sps:$4 sm:$0xff]   ;;  %v589_v35 = vld [vmem:[#allocation7 + $0xf0] ss:$8 sps:$4 sm:$0xff]   ;;  %s486_s21 = sshll.u32 %s703_s2, 4  ;;  %s487_s21 = int_to_ptr.vmem [resolvable:$true] %s486_s21 }
  0x42   :  { %s668_s23 = scalar_lea.vmem %s487_s21, 128  ;;  %p673_p11 = scmp.lt.s32.totalorder %s487_s21, %s487_s21 }
  0x43   :  { %p669_p10 = scmp.ne.s32.totalorder %s487_s21, %s668_s23  ;;  %p674_p12 = scmp.lt.s32.totalorder %s668_s23, %s668_s23 }
  0x44   :  { %264 = vmatpush1.bf16.msra.mxu0 %v553_v7  ;;  %313 = vmatpush1.bf16.msra.mxu1 %v553_v7 }
  0x45   :  { %265 = vmatprep.subr.bf16.mxu0 %v554_v8  ;;  %314 = vmatprep.subr.bf16.mxu1 %v554_v8  ;;  %p675_p13 = por %p674_p12, %p673_p11 }
  0x47   :  { %p676_p0 = pnand %p675_p13, %p669_p10 }
  0x48   :  { %266 = vmatpush1.bf16.msra.mxu0 %v556_v9  ;;  %315 = vmatpush1.bf16.msra.mxu1 %v556_v9 }
  0x49   :  { %267 = vmatprep.subr.bf16.mxu0 %v557_v10  ;;  %316 = vmatprep.subr.bf16.mxu1 %v557_v10 }
  0x4c   :  { %268 = vmatpush1.bf16.msra.mxu0 %v559_v11  ;;  %317 = vmatpush1.bf16.msra.mxu1 %v559_v11 }
  0x4d   :  { %269 = vmatprep.subr.bf16.mxu0 %v560_v12  ;;  %318 = vmatprep.subr.bf16.mxu1 %v560_v12 }
  0x50   :  { %270 = vmatpush1.bf16.msra.mxu0 %v562_v17  ;;  %319 = vmatpush1.bf16.msra.mxu1 %v562_v17 }
  0x51   :  { %271 = vmatprep.subr.bf16.mxu0 %v563_v18  ;;  %320 = vmatprep.subr.bf16.mxu1 %v563_v18 }
  0x54   :  { %272 = vmatpush1.bf16.msra.mxu0 %v565_v19  ;;  %321 = vmatpush1.bf16.msra.mxu1 %v565_v19 }
  0x55   :  { %273 = vmatprep.subr.bf16.mxu0 %v566_v20  ;;  %322 = vmatprep.subr.bf16.mxu1 %v566_v20 }
  0x58   :  { %274 = vmatpush1.bf16.msra.mxu0 %v568_v21  ;;  %323 = vmatpush1.bf16.msra.mxu1 %v568_v21 }
  0x59   :  { %275 = vmatprep.subr.bf16.mxu0 %v569_v22  ;;  %324 = vmatprep.subr.bf16.mxu1 %v569_v22 }
  0x5c   :  { %276 = vmatpush1.bf16.msra.mxu0 %v571_v23  ;;  %325 = vmatpush1.bf16.msra.mxu1 %v571_v23 }
  0x5d   :  { %277 = vmatprep.subr.bf16.mxu0 %v572_v24  ;;  %326 = vmatprep.subr.bf16.mxu1 %v572_v24 }
  0x60   :  { %278 = vmatpush1.bf16.msra.mxu0 %v574_v25  ;;  %327 = vmatpush1.bf16.msra.mxu1 %v574_v25 }
  0x61   :  { %279 = vmatprep.subr.bf16.mxu0 %v575_v26  ;;  %328 = vmatprep.subr.bf16.mxu1 %v575_v26 }
  0x64   :  { %280 = vmatpush1.bf16.msra.mxu0 %v577_v27  ;;  %329 = vmatpush1.bf16.msra.mxu1 %v577_v27 }
  0x65   :  { %281 = vmatprep.subr.bf16.mxu0 %v578_v28  ;;  %330 = vmatprep.subr.bf16.mxu1 %v578_v28 }
  0x68   :  { %282 = vmatpush1.bf16.msra.mxu0 %v580_v29  ;;  %331 = vmatpush1.bf16.msra.mxu1 %v580_v29 }
  0x69   :  { %283 = vmatprep.subr.bf16.mxu0 %v581_v30  ;;  %332 = vmatprep.subr.bf16.mxu1 %v581_v30 }
  0x6c   :  { %284 = vmatpush1.bf16.msra.mxu0 %v583_v31  ;;  %333 = vmatpush1.bf16.msra.mxu1 %v583_v31 }
  0x6d   :  { %285 = vmatprep.subr.bf16.mxu0 %v584_v32  ;;  %334 = vmatprep.subr.bf16.mxu1 %v584_v32 }
  0x70   :  { %286 = vmatpush1.bf16.msra.mxu0 %v586_v33  ;;  %335 = vmatpush1.bf16.msra.mxu1 %v586_v33 }
  0x71   :  { %287 = vmatprep.subr.bf16.mxu0 %v587_v34  ;;  %336 = vmatprep.subr.bf16.mxu1 %v587_v34 }
  0x74   :  { %288 = vmatpush1.bf16.msra.mxu0 %v589_v35  ;;  %337 = vmatpush1.bf16.msra.mxu1 %v589_v35 }
  0x77   :  { %290 = vmatmul.mubr.bf16.vlgmr.msra.gmra.mrb[0].mxu0 %v496_v36  ;;  %339 = vmatmul.mubr.bf16.vlgmr.msra.gmra.mrb[0].mxu1 %v530_v37 }
 0x14a   :  { %v772_v38 = vpop.f32.mrb[0].mxu0  ;;  %v774_v39 = vpop.f32.mrb[0].mxu1 }
 0x14b   :  { %v347_v40 = vmul.f32 %v772_v38, %v772_v38  ;;  %v778_v41 = vpop.f32.mrb[1].mxu0  ;;  %v780_v42 = vpop.f32.mrb[1].mxu1  ;;  %v783_v43 = vand.u32 2147483647, %v772_v38  ;;  %vm401_vm0 = vcmp.ne.f32.partialorder %v772_v38, %v772_v38  ;;  %v357_v46 = vmul.f32 %v774_v39, %v774_v39 }
 0x14c   :  { %v295_v44 = vpop.f32.mrb[2].mxu0  ;;  %v344_v45 = vpop.f32.mrb[2].mxu1  ;;  %v790_v47 = vand.u32 2147483647, %v774_v39  ;;  %v348_v48 = vmul.f32 %v778_v41, %v778_v41  ;;  %vm448_vm1 = vcmp.ne.f32.partialorder %v774_v39, %v774_v39  ;;  %v797_v51 = vand.u32 2147483647, %v778_v41 }
 0x14d   :  { %v296_v49 = vpop.f32.mrb[3].mxu0  ;;  %v345_v50 = vpop.f32.mrb[3].mxu1  ;;  %vm402_vm2 = vcmp.ne.f32.partialorder %v778_v41, %v778_v41  ;;  %v358_v54 = vmul.f32 %v780_v42, %v780_v42  ;;  %v808_v55 = vand.u32 2147483647, %v780_v42  ;;  %vm449_vm5 = vcmp.ne.f32.partialorder %v780_v42, %v780_v42 }
 0x14e   :  { %v349_v52 = vadd.f32 %v348_v48, %v347_v40  ;;  %vm801_vm3 = vmor %vm401_vm0, %vm402_vm2  ;;  %v369_v56 = vmin.f32 %v783_v43, %v797_v51  ;;  %v370_v57 = vmax.f32 %v783_v43, %v797_v51  ;;  %vm391_vm4 = vcmp.gt.f32.partialorder %v797_v51, %v783_v43 }
 0x14f   :  { %v359_v58 = vadd.f32 %v358_v54, %v357_v46  ;;  %v416_v59 = vmin.f32 %v790_v47, %v808_v55  ;;  %v417_v60 = vmax.f32 %v790_v47, %v808_v55  ;;  %vm438_vm6 = vcmp.gt.f32.partialorder %v808_v55, %v790_v47  ;;  %vm827_vm7 = vmor %vm448_vm1, %vm449_vm5 }
 0x150   :  { %594 = vrcp.f32 %v370_v57  ;;  %vm407_vm8 = vcmp.eq.s32.totalorder %v783_v43, inf  ;;  %vm408_vm9 = vcmp.eq.s32.totalorder %v797_v51, inf  ;;  %vm454_vm11 = vcmp.eq.s32.totalorder %v790_v47, inf }
 0x151   :  { %596 = vrcp.f32 %v417_v60  ;;  %vm833_vm10 = vmand %vm407_vm8, %vm408_vm9  ;;  %vm455_vm12 = vcmp.eq.s32.totalorder %v808_v55, inf  ;;  %vm352_vm14 = vcmp.eq.f32.partialorder %v349_v52, inf  ;;  %vm354_vm15 = vcmp.eq.f32.partialorder %v349_v52, 0.0 }
 0x152   :  { %598 = vrsqrt.f32 %v349_v52  ;;  %vm839_vm13 = vmand %vm454_vm11, %vm455_vm12  ;;  %v355_v9 = vand.u32 2147483648, %v349_v52  ;;  %vm362_vm0 = vcmp.eq.f32.partialorder %v359_v58, inf  ;;  %v365_v12 = vand.u32 2147483648, %v359_v58 }
 0x153   :  { %600 = vrsqrt.f32 %v359_v58  ;;  %vm364_vm1 = vcmp.eq.f32.partialorder %v359_v58, 0.0  ;;  %vm397_vm2 = vcmp.lt.s32.totalorder %v772_v38, 0  ;;  %vm444_vm5 = vcmp.lt.s32.totalorder %v774_v39, 0 }
 0x154   :  { %vm394_vm8 = vcmp.lt.f32.partialorder %v772_v38, 0.0  ;;  %vm441_vm9 = vcmp.lt.f32.partialorder %v774_v39, 0.0  ;;  %vm399_vm11 = vcmp.eq.f32.partialorder %v778_v41, 0.0  ;;  %v702_v47 = vmov 0.7853982  }
 0x155   :  { %v406_v55 = vsel %vm394_vm8, 2.3561945, %v702_v47  ;;  %v459_v53 = vand.u32 2147483648, %v780_v42 }
 0x15a   :  { %v595_v0 = vpop.eup %594 }
 0x15b   :  { %v597_v1 = vpop.eup %596  ;;  %v372_v2 = vmul.f32 %v595_v0, %v369_v56 }
 0x15c   :  { %v599_v3 = vpop.eup %598  ;;  %v419_v4 = vmul.f32 %v597_v1, %v416_v59 }
 0x15d   :  { %v601_v5 = vpop.eup %600  ;;  %v373_v6 = vmul.f32 %v372_v2, %v372_v2  ;;  %v351_v7 = vmul.f32 %v599_v3, %v349_v52 }
 0x15e   :  { %v420_v8 = vmul.f32 %v419_v4, %v419_v4  ;;  %v361_v10 = vmul.f32 %v601_v5, %v359_v58 }
 0x15f   :  { %v353_v11 = vsel %vm352_vm14, %v349_v52, %v351_v7  ;;  %v374_v13 = vmul.f32 0.002785687, %v373_v6 }
 0x160   :  { %v843_v14 = vsel %vm354_vm15, %v355_v9, %v353_v11  ;;  %v363_v15 = vsel %vm362_vm0, %v359_v58, %v361_v10  ;;  %v421_v16 = vmul.f32 0.002785687, %v420_v8  ;;  %v453_v11 = vsel %vm441_vm9, 2.3561945, %v702_v47 }
 0x161   :  { %v845_v17 = vsel %vm364_vm1, %v365_v12, %v363_v15  ;;  %v375_v18 = vadd.f32 -0.015866, %v374_v13  ;;  %v412_v13 = vand.u32 2147483648, %v778_v41 }
 0x162   :  { %v422_v19 = vadd.f32 -0.015866, %v421_v16  ;;  %v461_v20 = vsub.f32 %v843_v14, %v845_v17 }
 0x163   :  { %v376_v21 = vmul.f32 %v375_v18, %v373_v6 }
 0x164   :  { %v423_v22 = vmul.f32 %v422_v19, %v420_v8  ;;  %v462_v62 = vand.u32 2147483647, %v461_v20 }
 0x165   :  { %v377_v23 = vadd.f32 0.04247222, %v376_v21 }
 0x166   :  { %v424_v24 = vadd.f32 0.04247222, %v423_v22 }
 0x167   :  { %v378_v25 = vmul.f32 %v377_v23, %v373_v6 }
 0x168   :  { %v425_v26 = vmul.f32 %v424_v24, %v420_v8 }
 0x169   :  { %v379_v27 = vadd.f32 -0.074975304, %v378_v25 }
 0x16a   :  { %v426_v28 = vadd.f32 -0.074975304, %v425_v26 }
 0x16b   :  { %v380_v29 = vmul.f32 %v379_v27, %v373_v6 }
 0x16c   :  { %v427_v30 = vmul.f32 %v426_v28, %v420_v8 }
 0x16d   :  { %v381_v31 = vadd.f32 0.1064488, %v380_v29 }
 0x16e   :  { %v428_v32 = vadd.f32 0.1064488, %v427_v30 }
 0x16f   :  { %v382_v33 = vmul.f32 %v381_v31, %v373_v6 }
 0x170   :  { %v429_v34 = vmul.f32 %v428_v32, %v420_v8 }
 0x171   :  { %v383_v35 = vadd.f32 -0.14207031, %v382_v33 }
 0x172   :  { %v430_v36 = vadd.f32 -0.14207031, %v429_v34 }
 0x173   :  { %v384_v37 = vmul.f32 %v383_v35, %v373_v6 }
 0x174   :  { %v431_v40 = vmul.f32 %v430_v36, %v420_v8 }
 0x175   :  { %v385_v44 = vadd.f32 0.19993454, %v384_v37 }
 0x176   :  { %v432_v45 = vadd.f32 0.19993454, %v431_v40 }
 0x177   :  { %v386_v46 = vmul.f32 %v385_v44, %v373_v6 }
 0x178   :  { %v433_v48 = vmul.f32 %v432_v45, %v420_v8 }
 0x179   :  { %v387_v49 = vadd.f32 -0.33333147, %v386_v46 }
 0x17a   :  { %v434_v50 = vadd.f32 -0.33333147, %v433_v48 }
 0x17b   :  { %v388_v52 = vmul.f32 %v387_v49, %v373_v6 }
 0x17c   :  { %v435_v54 = vmul.f32 %v434_v50, %v420_v8 }
 0x17d   :  { %v389_v56 = vmul.f32 %v388_v52, %v372_v2 }
 0x17e   :  { %v436_v57 = vmul.f32 %v435_v54, %v419_v4 }
 0x17f   :  { %v390_v58 = vadd.f32 %v389_v56, %v372_v2  ;;  %v701_v2 = vmov 0.0  }
 0x180   :  { %v437_v59 = vadd.f32 %v436_v57, %v419_v4  ;;  %v398_v4 = vsel %vm397_vm2, 3.1415927, %v701_v2  ;;  %v445_v8 = vsel %vm444_vm5, 3.1415927, %v701_v2 }
 0x181   :  { %v392_v60 = vsub.f32 1.5707964, %v390_v58 }
 0x182   :  { %v439_v0 = vsub.f32 1.5707964, %v437_v59 }
 0x183   :  { %v393_v1 = vsel %vm391_vm4, %v392_v60, %v390_v58  ;;  %vm446_vm4 = vcmp.eq.f32.partialorder %v780_v42, 0.0 }
 0x184   :  { %v395_v3 = vsub.f32 3.1415927, %v393_v1  ;;  %v440_v5 = vsel %vm438_vm6, %v439_v0, %v437_v59 }
 0x185   :  { %v442_v6 = vsub.f32 3.1415927, %v440_v5 }
 0x186   :  { %v396_v7 = vsel %vm394_vm8, %v395_v3, %v393_v1 }
 0x187   :  { %v400_v43 = vsel %vm399_vm11, %v398_v4, %v396_v7  ;;  %v443_v51 = vsel %vm441_vm9, %v442_v6, %v440_v5 }
 0x188   :  { %v404_v9 = vsel %vm801_vm3, nan, %v400_v43  ;;  %v447_v10 = vsel %vm446_vm4, %v445_v8, %v443_v51 }
 0x189   :  { %v410_v38 = vsel %vm833_vm10, %v406_v55, %v404_v9  ;;  %v451_v39 = vsel %vm827_vm7, nan, %v447_v10 }
 0x18a   :  { %v411_v12 = vand.u32 2147483647, %v410_v38  ;;  %v457_v15 = vsel %vm839_vm13, %v453_v11, %v451_v39 }
 0x18b   :  { %v458_v16 = vand.u32 2147483647, %v457_v15 }
 0x18c   :  { %v413_v18 = vor.u32 %v412_v13, %v411_v12 }
 0x18d   :  { %v460_v19 = vor.u32 %v459_v53, %v458_v16 }
 0x18f   :  { %v463_v21 = vsub.f32 %v413_v18, %v460_v19 }
 0x191   :  { %v464_v22 = vand.u32 2147483647, %v463_v21 }
 0x193   :  { %v465_v61 = vmul.f32 0.5, %v464_v22 }
 0x195   :  { %v466_v23 = vadd.f32 %v465_v61, %v462_v62 }
 0x197   :  { %467 = vadd.xlane.f32.xlu0 %v466_v23 }
 0x224   :  { %v468_v24 = vpop.xlane.xlu0 %467 }
 0x225   :  { %v469_v25 = vrot.slane %v468_v24, 4 }
 0x227   :  { %v470_v41 = vadd.f32 %v469_v25, %v468_v24 }
 0x229   :  { %v471_v26 = vrot.slane %v470_v41, 2 }
 0x22b   :  { %v472_v63 = vadd.f32 %v471_v26, %v470_v41 }
 0x22d   :  { %v473_v27 = vrot.slane %v472_v63, 1 }
 0x22f   :  { %v474_v28 = vadd.f32 %v473_v27, %v472_v63 }
 0x231   :  { %532 = vpush %v474_v28 }
 0x262   :  { %s533_s22 = spop %532 }
 0x263   :  { %v477_v42 = vstv %s533_s22 }
 0x264   :  { %479 = vst [vmem:[#allocation8] sm:$0xff] %v477_v42 }
 0x265   :  { %679 = shalt.err (!%p676_p0)
}
 0x266   :  { %s680_s26 = scalar_lea.hbm %s889_s3, 128 }
 0x267   :  { %p681_p1 = scmp.ne.s32.totalorder %s889_s3, %s680_s26  ;;  %p684_p2 = scmp.lt.u32.totalorder %s680_s26, %s889_s3 }
 0x269   :  { %p686_p3 = pnand %p684_p2, %p681_p1 }
 0x26b   :  { %689 = shalt.err (!%p686_p3)
}
 0x26c   :  { %489 = dma.vmem_to_hbm [thread:$0]  %s487_s21, 128, %s889_s3, [#allocation4]  }
 0x26d   :  { %694 = dma.done.wait [#allocation4], 128  }
 0x26e   :  { %695 = vsyncadd [#allocation4], 4294967168 }
 0x26f   :  { %493 = vsyncpa [#allocation3], 1 }
 0x270   :  { %494 = vsyncpa [#allocation6], 1 }
 0x271   :  { %495 = vsyncpa [#allocation4], 1 }

</bundles_post_ra>
